<compile_context>
chip_gen: v6e
topology: v6e:2x2x1
jax: 0.10.0
libtpu: 0.0.40
codegen_flags: <defaults>
</compile_context>

<pallas_src>
import functools

import jax
import jax.numpy as jnp
from jax.experimental import pallas as pl
from jax.experimental.pallas import tpu as pltpu


def _round_up(n, m):
    return pl.cdiv(n, m) * m


# ----------------------------------------------------------------------------
# Fused PNN kernel: one-hot select -> layer-1 (+ cross terms) matmuls -> MLP -> sigmoid
# ----------------------------------------------------------------------------
def _make_pnn_kernel(num_fields, fd_pad, n_hidden):
    F = num_fields

    def kernel(*refs):
        x_ref, w1e_ref, tl_ref, tr_ref, wc_ref, b1_ref = refs[:6]
        hidden_refs = refs[6:6 + 2 * (n_hidden - 1)]
        wout_ref, bout_ref, o_ref = refs[6 + 2 * (n_hidden - 1):]

        bb = x_ref.shape[0]
        Kp = w1e_ref.shape[0]
        x = x_ref[...]                                         # (bb, F) int32

        # ---- single combined one-hot over the pre-offset index space ----
        # field f's index selects lane f*fd_pad + x[:, f]; fields occupy disjoint
        # lane blocks, so a logical-or accumulates the F matches.
        # (Out-of-range indices match nothing / a zero row -> zero embedding.)
        lane = jax.lax.broadcasted_iota(jnp.int32, (bb, Kp), 1)
        hit = lane == x[:, 0:1]
        for f in range(1, F):
            hit = jnp.logical_or(hit, lane == (x[:, f:f + 1] + f * fd_pad))
        onehot = hit.astype(jnp.bfloat16)                      # exact 0/1 rows

        # ---- layer 1: embedding tables folded into W1 -> one MXU matmul ----
        h = jnp.dot(onehot, w1e_ref[...],
                    preferred_element_type=jnp.float32) + b1_ref[...]

        # ---- pairwise inner products on the MXU ----
        # L[:, p*E:(p+1)*E] / R[:, p*E:(p+1)*E] are pair p's two field embeddings;
        # prod @ W_cross == sum_p <emb_i, emb_j> * W1_cross_row[p, :].
        L = jnp.dot(onehot, tl_ref[...], preferred_element_type=jnp.float32)
        R = jnp.dot(onehot, tr_ref[...], preferred_element_type=jnp.float32)
        prod = (L * R).astype(jnp.bfloat16)
        h = h + jnp.dot(prod, wc_ref[...], preferred_element_type=jnp.float32)
        h = jnp.maximum(h, 0.0)                                # Dropout == identity (eval)

        # ---- remaining hidden layers: Linear (BN folded) + ReLU ----
        for l in range(n_hidden - 1):
            w_ref, b_ref = hidden_refs[2 * l], hidden_refs[2 * l + 1]
            h = jnp.dot(h.astype(jnp.bfloat16), w_ref[...],
                        preferred_element_type=jnp.float32) + b_ref[...]
            h = jnp.maximum(h, 0.0)

        # ---- output Linear + sigmoid (epilogue in f32), bf16 store ----
        out = jnp.dot(h.astype(jnp.bfloat16), wout_ref[...],
                      preferred_element_type=jnp.float32) + bout_ref[...]
        o_ref[...] = jax.nn.sigmoid(out).astype(o_ref.dtype)

    return kernel


def pnn_forward_pallas(x_idx, mlp_params, *, num_fields, fd_pad, n_hidden, num_out,
                       block_b_cap=4096, out_dtype=jnp.bfloat16, slice_output=True):
    """x_idx: (B, num_fields) int32 field indices.

    Returns (B, num_out) f32 if slice_output, else the padded (B_pad, out_pad)
    `out_dtype` buffer (lets the consumer fuse the slice and skip an extra HBM pass).
    """
    B, F = x_idx.shape
    out_pad = mlp_params[-1].shape[1]

    # Batch tiling: block_b multiple of 8, capped; aim for >= 2 grid steps at moderate
    # B so dimension_semantics=("parallel",) can shard across both v7x TensorCores.
    block_b = min(block_b_cap, max(8, _round_up(pl.cdiv(max(B, 1), 2), 8)))
    B_pad = _round_up(B, block_b)
    if B_pad != B:
        x_idx = jnp.pad(x_idx, ((0, B_pad - B), (0, 0)))   # pad rows -> index 0 (valid)
    grid = (B_pad // block_b,)

    batch_map = lambda i: (i, 0)
    const2 = lambda i: (0, 0)

    # Weights/tables use constant index_maps -> DMA'd once, resident across the grid
    # (< 0.5 MiB total; default buffering kept instead of pl.Buffered(1) for safety).
    in_specs = [pl.BlockSpec((block_b, F), batch_map)]
    in_specs += [pl.BlockSpec(p.shape, const2) for p in mlp_params]

    kernel = _make_pnn_kernel(num_fields, fd_pad, n_hidden)

    out = pl.pallas_call(
        kernel,
        out_shape=jax.ShapeDtypeStruct((B_pad, out_pad), out_dtype),
        grid_spec=pltpu.PrefetchScalarGridSpec(
            num_scalar_prefetch=0,
            grid=grid,
            in_specs=in_specs,
            out_specs=pl.BlockSpec((block_b, out_pad), batch_map),
        ),
        compiler_params=pltpu.CompilerParams(
            dimension_semantics=("parallel",),
            vmem_limit_bytes=48 * 1024 * 1024),
    )(x_idx, *mlp_params)

    if slice_output:
        return out[:B, :num_out].astype(jnp.float32)
    return out


# ----------------------------------------------------------------------------
# Model wrapper: init with BN folding, embedding-table folding and lane padding
# ----------------------------------------------------------------------------
class DrugPNNModelPallas:
    def __init__(self, field_dims, embed_dim, mlp_dims, dropout, num_ADR, key,
                 method='inner'):
        if method != 'inner':
            # TODO(synk): method='outer' (OuterProductNetwork) not implemented.
            raise ValueError('only the inner-product PNN variant is implemented')

        eps = 1e-5
        F = len(field_dims)
        E = embed_dim
        self.num_fields = F
        self.embed_dim = E
        self.embed_output_dim = F * E
        self.num_ADR = num_ADR
        self.dropout = dropout                  # identity at inference
        self.mlp_dims = tuple(mlp_dims)
        self.field_dims = tuple(field_dims)
        self.pairs = tuple((i, j) for i in range(F) for j in range(i + 1, F))
        P = len(self.pairs)
        self.name = 'PNN'

        # Padded geometry of the fused one-hot feature space.
        fd_pad = _round_up(max(field_dims), 8)      # per-field sublane-aligned block
        K_pad = _round_up(F * fd_pad, 128)          # MXU-friendly contraction dim
        PE_pad = _round_up(P * E, 128)
        self.fd_pad = fd_pad

        n_hidden = len(mlp_dims)
        keys = iter(jax.random.split(key, F + 6 * n_hidden + 2))
        nk = lambda: next(keys)

        # Per-field embedding tables (bf16-rounded so kernel weights and the f32
        # reference share the exact same table values).
        tables = []
        for fd in field_dims:
            t = 0.1 * jax.random.normal(nk(), (fd, E), jnp.float32)
            tables.append(t.astype(jnp.bfloat16).astype(jnp.float32))
        self._tables_f32 = tables

        def linear_init(fan_in, fan_out):
            bound = 1.0 / (fan_in ** 0.5)
            w = jax.random.uniform(nk(), (fan_in, fan_out), jnp.float32, -bound, bound)
            b = jax.random.uniform(nk(), (1, fan_out), jnp.float32, -bound, bound)
            return w, b

        def bn_fold(h):
            gamma = 1.0 + 0.05 * jax.random.normal(nk(), (1, h), jnp.float32)
            beta = 0.05 * jax.random.normal(nk(), (1, h), jnp.float32)
            mean = 0.05 * jax.random.normal(nk(), (1, h), jnp.float32)
            var = jnp.abs(1.0 + 0.05 * jax.random.normal(nk(), (1, h), jnp.float32))
            scale = gamma / jnp.sqrt(var + eps)
            shift = beta - mean * scale
            return scale, shift

        ref_layers = []   # unpadded f32 (BN folded) weights, original structure

        # ---- layer 1: Linear(D0 + P, H1) with BN folded, re-expressed as ----
        #   W1_emb  = blockdiag(tables) @ W1[:D0]   (embedding path, one matmul)
        #   W_cross = repeat(W1[D0:], E, axis=0)    (cross-term path on the MXU)
        D0 = self.embed_output_dim
        H1 = mlp_dims[0]
        H1p = _round_up(H1, 128)
        w, b = linear_init(D0 + P, H1)
        scale, shift = bn_fold(H1)
        w = w * scale
        b = b * scale + shift
        ref_layers.append((w, b))

        w1a = jnp.pad(w[:D0], ((0, 0), (0, H1p - H1)))           # (D0, H1p)
        w1b = jnp.pad(w[D0:], ((0, 0), (0, H1p - H1)))           # (P, H1p)
        b1 = jnp.pad(b, ((0, 0), (0, H1p - H1)))                 # (1, H1p)

        W1_emb = jnp.zeros((K_pad, H1p), jnp.float32)
        T_L = jnp.zeros((K_pad, PE_pad), jnp.float32)
        T_R = jnp.zeros((K_pad, PE_pad), jnp.float32)
        for f, fd in enumerate(field_dims):
            blk = tables[f] @ w1a[f * E:(f + 1) * E, :]          # (fd, H1p)
            W1_emb = W1_emb.at[f * fd_pad:f * fd_pad + fd, :].set(blk)
        for p, (i, j) in enumerate(self.pairs):
            T_L = T_L.at[i * fd_pad:i * fd_pad + field_dims[i],
                         p * E:(p + 1) * E].set(tables[i])
            T_R = T_R.at[j * fd_pad:j * fd_pad + field_dims[j],
                         p * E:(p + 1) * E].set(tables[j])
        W_cross = jnp.zeros((PE_pad, H1p), jnp.float32)
        W_cross = W_cross.at[:P * E, :].set(jnp.repeat(w1b, E, axis=0))

        params = [W1_emb.astype(jnp.bfloat16), T_L.astype(jnp.bfloat16),
                  T_R.astype(jnp.bfloat16), W_cross.astype(jnp.bfloat16), b1]

        # ---- remaining hidden layers: Linear + BN(eval) folded, lane padded ----
        in_dim, in_pad = H1, H1p
        for h in mlp_dims[1:]:
            w, b = linear_init(in_dim, h)
            scale, shift = bn_fold(h)
            w = w * scale
            b = b * scale + shift
            ref_layers.append((w, b))
            h_pad = _round_up(h, 128)
            params += [jnp.pad(w, ((0, in_pad - in_dim), (0, h_pad - h))).astype(jnp.bfloat16),
                       jnp.pad(b, ((0, 0), (0, h_pad - h)))]
            in_dim, in_pad = h, h_pad

        # ---- output layer: plain Linear(mlp_dims[-1], num_ADR), lane padded ----
        w, b = linear_init(in_dim, num_ADR)
        ref_layers.append((w, b))
        out_pad = _round_up(num_ADR, 128)
        params += [jnp.pad(w, ((0, in_pad - in_dim), (0, out_pad - num_ADR))).astype(jnp.bfloat16),
                   jnp.pad(b, ((0, 0), (0, out_pad - num_ADR)))]

        self.mlp_params = tuple(params)
        self._ref_layers = tuple(ref_layers)

    @functools.partial(jax.jit, static_argnums=0)
    def __call__(self, x):
        return pnn_forward_pallas(
            x.astype(jnp.int32), self.mlp_params,
            num_fields=self.num_fields, fd_pad=self.fd_pad,
            n_hidden=len(self.mlp_dims), num_out=self.num_ADR)

    def reference(self, x):
        """Pure-JAX f32 forward in the ORIGINAL PNN structure: embedding lookup,
        explicit pairwise inner products, concat, MLP (BN folded), sigmoid."""
        x = jnp.asarray(x, jnp.int32)
        parts = [t[x[:, f]] for f, t in enumerate(self._tables_f32)]
        embed = jnp.concatenate(parts, axis=-1)
        cross = jnp.stack([jnp.sum(parts[i] * parts[j], axis=-1)
                           for (i, j) in self.pairs], axis=-1)
        h = jnp.concatenate([embed, cross], axis=-1)
        for li, (w, b) in enumerate(self._ref_layers):
            h = h @ w + b
            if li < len(self._ref_layers) - 1:
                h = jnp.maximum(h, 0.0)
        return jax.nn.sigmoid(h)


if __name__ == "__main__":
    field_dims = [10, 20, 30, 40]
    embed_dim = 16
    mlp_dims = (64, 32)
    dropout = 0.2
    num_ADR = 27
    batch = 8

    key = jax.random.PRNGKey(0)
    k_model, k_x = jax.random.split(key)
    model = DrugPNNModelPallas(field_dims, embed_dim, mlp_dims, dropout, num_ADR, k_model)

    # Long-tensor input (batch, num_features): one index per field (always in range).
    maxes = jnp.array(field_dims, jnp.float32)
    u = jax.random.uniform(k_x, (batch, len(field_dims)), jnp.float32)
    x = (u * maxes[None, :]).astype(jnp.int32)

    out = jax.block_until_ready(model(x))
    ref = model.reference(x)

    assert out.shape == (batch, num_ADR)
    assert bool(jnp.all(jnp.isfinite(out)))
    # Kernel uses bf16 weights / bf16 activations-in / bf16 output; reference is f32 in
    # the original (unfused) structure -> expect ~3e-3 worst-case on sigmoid outputs.
    err = float(jnp.max(jnp.abs(out - ref)))
    assert err < 1e-2, f"mismatch vs reference: max|diff|={err}"
    print("KERNEL_OK")
</pallas_src>

<mosaic_0001>
module attributes {stable_mosaic.version = 11 : i64} {
  func.func @kernel(%arg0: i32, %arg1: memref<8x4xi32, #tpu.memory_space<vmem>>, %arg2: memref<256x128xbf16, #tpu.memory_space<vmem>>, %arg3: memref<256x128xbf16, #tpu.memory_space<vmem>>, %arg4: memref<256x128xbf16, #tpu.memory_space<vmem>>, %arg5: memref<128x128xbf16, #tpu.memory_space<vmem>>, %arg6: memref<1x128xf32, #tpu.memory_space<vmem>>, %arg7: memref<128x128xbf16, #tpu.memory_space<vmem>>, %arg8: memref<1x128xf32, #tpu.memory_space<vmem>>, %arg9: memref<128x128xbf16, #tpu.memory_space<vmem>>, %arg10: memref<1x128xf32, #tpu.memory_space<vmem>>, %arg11: memref<8x128xbf16, #tpu.memory_space<vmem>>) attributes {dimension_semantics = [#tpu.dimension_semantics<parallel>], iteration_bounds = array<i64: 1>, scalar_prefetch = 0 : i64, scratch_operands = 0 : i64, tpu.core_type = #tpu.core_type<tc>, window_params = [{transform_indices = @transform_0, window_bounds = array<i64: 8, 4>}, {pipeline_mode = #tpu.pipeline_mode<synchronous>, transform_indices = @transform_1, window_bounds = array<i64: 256, 128>}, {pipeline_mode = #tpu.pipeline_mode<synchronous>, transform_indices = @transform_2, window_bounds = array<i64: 256, 128>}, {pipeline_mode = #tpu.pipeline_mode<synchronous>, transform_indices = @transform_3, window_bounds = array<i64: 256, 128>}, {pipeline_mode = #tpu.pipeline_mode<synchronous>, transform_indices = @transform_4, window_bounds = array<i64: 128, 128>}, {pipeline_mode = #tpu.pipeline_mode<synchronous>, transform_indices = @transform_5, window_bounds = array<i64: 1, 128>}, {pipeline_mode = #tpu.pipeline_mode<synchronous>, transform_indices = @transform_6, window_bounds = array<i64: 128, 128>}, {pipeline_mode = #tpu.pipeline_mode<synchronous>, transform_indices = @transform_7, window_bounds = array<i64: 1, 128>}, {pipeline_mode = #tpu.pipeline_mode<synchronous>, transform_indices = @transform_8, window_bounds = array<i64: 128, 128>}, {pipeline_mode = #tpu.pipeline_mode<synchronous>, transform_indices = @transform_9, window_bounds = array<i64: 1, 128>}, {transform_indices = @transform_10, window_bounds = array<i64: 8, 128>}]} {
    %c0 = arith.constant 0 : index
    %c0_0 = arith.constant 0 : index
    %0 = vector.load %arg1[%c0, %c0_0] : memref<8x4xi32, #tpu.memory_space<vmem>>, vector<8x4xi32>
    %1 = tpu.iota {dimensions = array<i32: 1>} : vector<8x256xi32>
    %2 = vector.extract_strided_slice %0 {offsets = [0, 0], sizes = [8, 1], strides = [1, 1]} : vector<8x4xi32> to vector<8x1xi32>
    %3 = vector.broadcast %2 : vector<8x1xi32> to vector<8x256xi32>
    %4 = arith.cmpi eq, %1, %3 : vector<8x256xi32>
    %5 = vector.extract_strided_slice %0 {offsets = [0, 1], sizes = [8, 1], strides = [1, 1]} : vector<8x4xi32> to vector<8x1xi32>
    %c40_i32 = arith.constant 40 : i32
    %6 = vector.broadcast %c40_i32 : i32 to vector<8x1xi32>
    %7 = arith.addi %5, %6 : vector<8x1xi32>
    %8 = vector.broadcast %7 : vector<8x1xi32> to vector<8x256xi32>
    %9 = arith.cmpi eq, %1, %8 : vector<8x256xi32>
    %10 = arith.ori %4, %9 : vector<8x256xi1>
    %11 = vector.extract_strided_slice %0 {offsets = [0, 2], sizes = [8, 1], strides = [1, 1]} : vector<8x4xi32> to vector<8x1xi32>
    %c80_i32 = arith.constant 80 : i32
    %12 = vector.broadcast %c80_i32 : i32 to vector<8x1xi32>
    %13 = arith.addi %11, %12 : vector<8x1xi32>
    %14 = vector.broadcast %13 : vector<8x1xi32> to vector<8x256xi32>
    %15 = arith.cmpi eq, %1, %14 : vector<8x256xi32>
    %16 = arith.ori %10, %15 : vector<8x256xi1>
    %17 = vector.extract_strided_slice %0 {offsets = [0, 3], sizes = [8, 1], strides = [1, 1]} : vector<8x4xi32> to vector<8x1xi32>
    %c120_i32 = arith.constant 120 : i32
    %18 = vector.broadcast %c120_i32 : i32 to vector<8x1xi32>
    %19 = arith.addi %17, %18 : vector<8x1xi32>
    %20 = vector.broadcast %19 : vector<8x1xi32> to vector<8x256xi32>
    %21 = arith.cmpi eq, %1, %20 : vector<8x256xi32>
    %22 = arith.ori %16, %21 : vector<8x256xi1>
    %23 = arith.extui %22 : vector<8x256xi1> to vector<8x256xi32>
    %24 = arith.sitofp %23 : vector<8x256xi32> to vector<8x256xf32>
    %25 = arith.truncf %24 : vector<8x256xf32> to vector<8x256xbf16>
    %c0_1 = arith.constant 0 : index
    %c0_2 = arith.constant 0 : index
    %26 = vector.load %arg2[%c0_1, %c0_2] : memref<256x128xbf16, #tpu.memory_space<vmem>>, vector<256x128xbf16>
    %cst = arith.constant dense<0.000000e+00> : vector<8x128xf32>
    %27 = tpu.matmul %25, %26, %cst {dimension_numbers = #tpu.dot_dimension_numbers<[1], [0], [0], [1], [0, 0, 1, 1], [], []>} : vector<8x256xbf16>, vector<256x128xbf16>, vector<8x128xf32> -> vector<8x128xf32>
    %c0_3 = arith.constant 0 : index
    %c0_4 = arith.constant 0 : index
    %28 = vector.load %arg6[%c0_3, %c0_4] : memref<1x128xf32, #tpu.memory_space<vmem>>, vector<1x128xf32>
    %29 = vector.broadcast %28 : vector<1x128xf32> to vector<8x128xf32>
    %30 = arith.addf %27, %29 : vector<8x128xf32>
    %c0_5 = arith.constant 0 : index
    %c0_6 = arith.constant 0 : index
    %31 = vector.load %arg3[%c0_5, %c0_6] : memref<256x128xbf16, #tpu.memory_space<vmem>>, vector<256x128xbf16>
    %cst_7 = arith.constant dense<0.000000e+00> : vector<8x128xf32>
    %32 = tpu.matmul %25, %31, %cst_7 {dimension_numbers = #tpu.dot_dimension_numbers<[1], [0], [0], [1], [0, 0, 1, 1], [], []>} : vector<8x256xbf16>, vector<256x128xbf16>, vector<8x128xf32> -> vector<8x128xf32>
    %c0_8 = arith.constant 0 : index
    %c0_9 = arith.constant 0 : index
    %33 = vector.load %arg4[%c0_8, %c0_9] : memref<256x128xbf16, #tpu.memory_space<vmem>>, vector<256x128xbf16>
    %cst_10 = arith.constant dense<0.000000e+00> : vector<8x128xf32>
    %34 = tpu.matmul %25, %33, %cst_10 {dimension_numbers = #tpu.dot_dimension_numbers<[1], [0], [0], [1], [0, 0, 1, 1], [], []>} : vector<8x256xbf16>, vector<256x128xbf16>, vector<8x128xf32> -> vector<8x128xf32>
    %35 = arith.mulf %32, %34 : vector<8x128xf32>
    %36 = arith.truncf %35 : vector<8x128xf32> to vector<8x128xbf16>
    %c0_11 = arith.constant 0 : index
    %c0_12 = arith.constant 0 : index
    %37 = vector.load %arg5[%c0_11, %c0_12] : memref<128x128xbf16, #tpu.memory_space<vmem>>, vector<128x128xbf16>
    %cst_13 = arith.constant dense<0.000000e+00> : vector<8x128xf32>
    %38 = tpu.matmul %36, %37, %cst_13 {dimension_numbers = #tpu.dot_dimension_numbers<[1], [0], [0], [1], [0, 0, 1, 1], [], []>} : vector<8x128xbf16>, vector<128x128xbf16>, vector<8x128xf32> -> vector<8x128xf32>
    %39 = arith.addf %30, %38 : vector<8x128xf32>
    %cst_14 = arith.constant 0.000000e+00 : f32
    %40 = vector.broadcast %cst_14 : f32 to vector<8x128xf32>
    %41 = arith.maximumf %39, %40 : vector<8x128xf32>
    %42 = arith.truncf %41 : vector<8x128xf32> to vector<8x128xbf16>
    %c0_15 = arith.constant 0 : index
    %c0_16 = arith.constant 0 : index
    %43 = vector.load %arg7[%c0_15, %c0_16] : memref<128x128xbf16, #tpu.memory_space<vmem>>, vector<128x128xbf16>
    %cst_17 = arith.constant dense<0.000000e+00> : vector<8x128xf32>
    %44 = tpu.matmul %42, %43, %cst_17 {dimension_numbers = #tpu.dot_dimension_numbers<[1], [0], [0], [1], [0, 0, 1, 1], [], []>} : vector<8x128xbf16>, vector<128x128xbf16>, vector<8x128xf32> -> vector<8x128xf32>
    %c0_18 = arith.constant 0 : index
    %c0_19 = arith.constant 0 : index
    %45 = vector.load %arg8[%c0_18, %c0_19] : memref<1x128xf32, #tpu.memory_space<vmem>>, vector<1x128xf32>
    %46 = vector.broadcast %45 : vector<1x128xf32> to vector<8x128xf32>
    %47 = arith.addf %44, %46 : vector<8x128xf32>
    %cst_20 = arith.constant 0.000000e+00 : f32
    %48 = vector.broadcast %cst_20 : f32 to vector<8x128xf32>
    %49 = arith.maximumf %47, %48 : vector<8x128xf32>
    %50 = arith.truncf %49 : vector<8x128xf32> to vector<8x128xbf16>
    %c0_21 = arith.constant 0 : index
    %c0_22 = arith.constant 0 : index
    %51 = vector.load %arg9[%c0_21, %c0_22] : memref<128x128xbf16, #tpu.memory_space<vmem>>, vector<128x128xbf16>
    %cst_23 = arith.constant dense<0.000000e+00> : vector<8x128xf32>
    %52 = tpu.matmul %50, %51, %cst_23 {dimension_numbers = #tpu.dot_dimension_numbers<[1], [0], [0], [1], [0, 0, 1, 1], [], []>} : vector<8x128xbf16>, vector<128x128xbf16>, vector<8x128xf32> -> vector<8x128xf32>
    %c0_24 = arith.constant 0 : index
    %c0_25 = arith.constant 0 : index
    %53 = vector.load %arg10[%c0_24, %c0_25] : memref<1x128xf32, #tpu.memory_space<vmem>>, vector<1x128xf32>
    %54 = vector.broadcast %53 : vector<1x128xf32> to vector<8x128xf32>
    %55 = arith.addf %52, %54 : vector<8x128xf32>
    %56 = arith.negf %55 : vector<8x128xf32>
    %57 = math.exp %56 : vector<8x128xf32>
    %cst_26 = arith.constant 1.000000e+00 : f32
    %58 = vector.broadcast %cst_26 : f32 to vector<8x128xf32>
    %59 = arith.addf %58, %57 : vector<8x128xf32>
    %60 = arith.divf %58, %59 : vector<8x128xf32>
    %61 = arith.truncf %60 : vector<8x128xf32> to vector<8x128xbf16>
    %c0_27 = arith.constant 0 : index
    %c0_28 = arith.constant 0 : index
    %62 = vector.load %arg11[%c0_27, %c0_28] : memref<8x128xbf16, #tpu.memory_space<vmem>>, vector<8x128xbf16>
    tpu.vector_store %arg11[%c0_27, %c0_28], %61 {strides = array<i32>} : memref<8x128xbf16, #tpu.memory_space<vmem>>, vector<8x128xbf16>,
    return
  }
  func.func @transform_0(%arg0: i32) -> (i32, i32) {
    %c0_i32 = arith.constant 0 : i32
    %c0_i32_0 = arith.constant 0 : i32
    return %arg0, %c0_i32 : i32, i32
  }
  func.func @transform_1(%arg0: i32) -> (i32, i32) {
    %c0_i32 = arith.constant 0 : i32
    %c0_i32_0 = arith.constant 0 : i32
    %c0_i32_1 = arith.constant 0 : i32
    return %c0_i32, %c0_i32_0 : i32, i32
  }
  func.func @transform_2(%arg0: i32) -> (i32, i32) {
    %c0_i32 = arith.constant 0 : i32
    %c0_i32_0 = arith.constant 0 : i32
    %c0_i32_1 = arith.constant 0 : i32
    return %c0_i32, %c0_i32_0 : i32, i32
  }
  func.func @transform_3(%arg0: i32) -> (i32, i32) {
    %c0_i32 = arith.constant 0 : i32
    %c0_i32_0 = arith.constant 0 : i32
    %c0_i32_1 = arith.constant 0 : i32
    return %c0_i32, %c0_i32_0 : i32, i32
  }
  func.func @transform_4(%arg0: i32) -> (i32, i32) {
    %c0_i32 = arith.constant 0 : i32
    %c0_i32_0 = arith.constant 0 : i32
    %c0_i32_1 = arith.constant 0 : i32
    return %c0_i32, %c0_i32_0 : i32, i32
  }
  func.func @transform_5(%arg0: i32) -> (i32, i32) {
    %c0_i32 = arith.constant 0 : i32
    %c0_i32_0 = arith.constant 0 : i32
    %c0_i32_1 = arith.constant 0 : i32
    return %c0_i32, %c0_i32_0 : i32, i32
  }
  func.func @transform_6(%arg0: i32) -> (i32, i32) {
    %c0_i32 = arith.constant 0 : i32
    %c0_i32_0 = arith.constant 0 : i32
    %c0_i32_1 = arith.constant 0 : i32
    return %c0_i32, %c0_i32_0 : i32, i32
  }
  func.func @transform_7(%arg0: i32) -> (i32, i32) {
    %c0_i32 = arith.constant 0 : i32
    %c0_i32_0 = arith.constant 0 : i32
    %c0_i32_1 = arith.constant 0 : i32
    return %c0_i32, %c0_i32_0 : i32, i32
  }
  func.func @transform_8(%arg0: i32) -> (i32, i32) {
    %c0_i32 = arith.constant 0 : i32
    %c0_i32_0 = arith.constant 0 : i32
    %c0_i32_1 = arith.constant 0 : i32
    return %c0_i32, %c0_i32_0 : i32, i32
  }
  func.func @transform_9(%arg0: i32) -> (i32, i32) {
    %c0_i32 = arith.constant 0 : i32
    %c0_i32_0 = arith.constant 0 : i32
    %c0_i32_1 = arith.constant 0 : i32
    return %c0_i32, %c0_i32_0 : i32, i32
  }
  func.func @transform_10(%arg0: i32) -> (i32, i32) {
    %c0_i32 = arith.constant 0 : i32
    %c0_i32_0 = arith.constant 0 : i32
    return %arg0, %c0_i32 : i32, i32
  }
}

</mosaic_0001>

<bundles_post_ra>
// kernel: a_call__.1
= control target key start
LH: loop header
LB: loop body
LE: loop exit
PB: predicated region body
PF: predicated region fallthrough
CT: control target
= control target key end

     0   :  { %15 = vsyncpa [#allocation3], 0  ;;  %s1645_s0 = inlined_call_operand.vmem [shape: s32[8,4], index: 0, kind: input, shape index: {}]   ;;  %s1646_s1 = inlined_call_operand.hbm [shape: bf16[256,128], index: 1, kind: input, shape index: {}]   ;;  %s1647_s2 = inlined_call_operand.hbm [shape: bf16[256,128], index: 2, kind: input, shape index: {}]   ;;  %s1648_s3 = inlined_call_operand.hbm [shape: bf16[256,128], index: 3, kind: input, shape index: {}]   ;;  %s1649_s4 = inlined_call_operand.hbm [shape: bf16[128,128], index: 4, kind: input, shape index: {}]   ;;  %s1650_s5 = inlined_call_operand.vmem [shape: f32[1,128], index: 5, kind: input, shape index: {}]   ;;  %s1651_s6 = inlined_call_operand.hbm [shape: bf16[128,128], index: 6, kind: input, shape index: {}]   ;;  %s1652_s7 = inlined_call_operand.vmem [shape: f32[1,128], index: 7, kind: input, shape index: {}]   ;;  %s1653_s8 = inlined_call_operand.hbm [shape: bf16[128,128], index: 8, kind: input, shape index: {}]   ;;  %s1654_s9 = inlined_call_operand.vmem [shape: f32[1,128], index: 9, kind: input, shape index: {}]   ;;  %s1655_s10 = inlined_call_operand.vmem [shape: bf16[8,128], index: 10, kind: output, shape index: {}]  }
   0x1   :  { %16 = vsyncpa [#allocation5], 0 }
   0x2   :  { %17 = vsyncpa [#allocation8], 0 }
   0x3   :  { %18 = vsyncpa [#allocation11], 0  ;;  %s1484_s13 = smov [#allocation4]   ;;  %s1485_s15 = smov [#allocation7]  }
   0x4   :  { %s38_s14 = sshll.u32 %s1484_s13, 4  ;;  %s62_s16 = sshll.u32 %s1485_s15, 4  ;;  %s39_s14 = int_to_ptr.vmem [resolvable:$true] %s38_s14  ;;  %s63_s16 = int_to_ptr.vmem [resolvable:$true] %s62_s16 }
   0x5   :  { %s1364_s17 = scalar_lea.vmem %s39_s14, 2048  ;;  %p1369_p1 = scmp.lt.s32.totalorder %s39_s14, %s39_s14 }
   0x6   :  { %p1365_p0 = scmp.ne.s32.totalorder %s39_s14, %s1364_s17  ;;  %p1370_p2 = scmp.lt.s32.totalorder %s1364_s17, %s1364_s17 }
   0x8   :  { %p1371_p3 = por %p1370_p2, %p1369_p1 }
   0xa   :  { %p1372_p4 = pnand %p1371_p3, %p1365_p0 }
   0xc   :  { %1375 = shalt.err (!%p1372_p4)
}
   0xd   :  { %s1486_s18 = smov 64   ;;  %s1487_s19 = smov 4  }
   0xe   :  { %44 = dma.hbm_to_vmem [thread:$0]  %s1647_s2, 2048, %s39_s14, [#allocation5], %s1486_s18, %s1486_s18, %s1487_s19  }
   0xf   :  { %s1384_s22 = scalar_lea.vmem %s63_s16, 1024  ;;  %p1389_p6 = scmp.lt.s32.totalorder %s63_s16, %s63_s16 }
  0x10   :  { %p1385_p5 = scmp.ne.s32.totalorder %s63_s16, %s1384_s22  ;;  %p1390_p7 = scmp.lt.s32.totalorder %s1384_s22, %s1384_s22 }
  0x12   :  { %p1391_p8 = por %p1390_p7, %p1389_p6 }
  0x14   :  { %p1392_p9 = pnand %p1391_p8, %p1385_p5 }
  0x16   :  { %1395 = shalt.err (!%p1392_p9)
}
  0x17   :  { %68 = dma.hbm_to_vmem [thread:$0]  %s1649_s4, 1024, %s63_s16, [#allocation8], %s1486_s18, %s1486_s18, %s1487_s19  }
  0x18   :  { %s1488_s25 = smov [#allocation2]   ;;  %s1489_s27 = smov [#allocation6]  }
  0x19   :  { %s26_s26 = sshll.u32 %s1488_s25, 4  ;;  %s50_s28 = sshll.u32 %s1489_s27, 4  ;;  %s27_s26 = int_to_ptr.vmem [resolvable:$true] %s26_s26  ;;  %s51_s28 = int_to_ptr.vmem [resolvable:$true] %s50_s28 }
  0x1a   :  { %s1404_s2 = scalar_lea.vmem %s27_s26, 2048  ;;  %p1409_p11 = scmp.lt.s32.totalorder %s27_s26, %s27_s26 }
  0x1b   :  { %p1405_p10 = scmp.ne.s32.totalorder %s27_s26, %s1404_s2  ;;  %p1410_p12 = scmp.lt.s32.totalorder %s1404_s2, %s1404_s2 }
  0x1d   :  { %p1411_p13 = por %p1410_p12, %p1409_p11 }
  0x1f   :  { %p1412_p0 = pnand %p1411_p13, %p1405_p10 }
  0x21   :  { %1415 = shalt.err (!%p1412_p0)
}
  0x22   :  { %32 = dma.hbm_to_vmem [thread:$0]  %s1646_s1, 2048, %s27_s26, [#allocation3], %s1486_s18, %s1486_s18, %s1487_s19  }
  0x23   :  { %s1424_s4 = scalar_lea.vmem %s51_s28, 2048  ;;  %p1429_p2 = scmp.lt.s32.totalorder %s51_s28, %s51_s28 }
  0x24   :  { %p1425_p1 = scmp.ne.s32.totalorder %s51_s28, %s1424_s4  ;;  %p1430_p3 = scmp.lt.s32.totalorder %s1424_s4, %s1424_s4 }
  0x26   :  { %p1431_p4 = por %p1430_p3, %p1429_p2 }
  0x28   :  { %p1432_p5 = pnand %p1431_p4, %p1425_p1 }
  0x2a   :  { %1435 = shalt.err (!%p1432_p5)
}
  0x2b   :  { %56 = dma.hbm_to_vmem [thread:$0]  %s1648_s3, 2048, %s51_s28, [#allocation5], %s1486_s18, %s1486_s18, %s1487_s19  }
  0x2c   :  { %s1490_s13 = smov [#allocation9]   ;;  %s1491_s15 = smov [#allocation10]  }
  0x2d   :  { %s76_s14 = sshll.u32 %s1490_s13, 4  ;;  %s90_s16 = sshll.u32 %s1491_s15, 4  ;;  %s77_s14 = int_to_ptr.vmem [resolvable:$true] %s76_s14  ;;  %s91_s16 = int_to_ptr.vmem [resolvable:$true] %s90_s16 }
  0x2e   :  { %s1444_s1 = scalar_lea.vmem %s77_s14, 1024  ;;  %p1449_p7 = scmp.lt.s32.totalorder %s77_s14, %s77_s14 }
  0x2f   :  { %p1445_p6 = scmp.ne.s32.totalorder %s77_s14, %s1444_s1  ;;  %p1450_p8 = scmp.lt.s32.totalorder %s1444_s1, %s1444_s1 }
  0x31   :  { %p1451_p9 = por %p1450_p8, %p1449_p7 }
  0x33   :  { %p1452_p10 = pnand %p1451_p9, %p1445_p6 }
  0x35   :  { %1455 = shalt.err (!%p1452_p10)
}
  0x36   :  { %82 = dma.hbm_to_vmem [thread:$0]  %s1651_s6, 1024, %s77_s14, [#allocation8], %s1486_s18, %s1486_s18, %s1487_s19  }
  0x37   :  { %s1464_s3 = scalar_lea.vmem %s91_s16, 1024  ;;  %p1469_p12 = scmp.lt.s32.totalorder %s91_s16, %s91_s16 }
  0x38   :  { %p1465_p11 = scmp.ne.s32.totalorder %s91_s16, %s1464_s3  ;;  %p1470_p13 = scmp.lt.s32.totalorder %s1464_s3, %s1464_s3 }
  0x3a   :  { %p1471_p0 = por %p1470_p13, %p1469_p12 }
  0x3c   :  { %p1472_p1 = pnand %p1471_p0, %p1465_p11 }
  0x3e   :  { %1475 = shalt.err (!%p1472_p1)
}
  0x3f   :  { %96 = dma.hbm_to_vmem [thread:$0]  %s1653_s8, 1024, %s91_s16, [#allocation11], %s1486_s18, %s1486_s18, %s1487_s19  }
  0x40   :  { %1476 = dma.done.wait [#allocation3], 2048  }
  0x41   :  { %1477 = vsyncadd [#allocation3], 4294965248 }
  0x42   :  { %1478 = dma.done.wait [#allocation5], 4096  }
  0x43   :  { %1479 = vsyncadd [#allocation5], 4294963200 }
  0x44   :  { %1480 = dma.done.wait [#allocation8], 2048  }
  0x45   :  { %1481 = vsyncadd [#allocation8], 4294965248 }
  0x46   :  { %1482 = dma.done.wait [#allocation11], 1024  }
  0x47   :  { %1483 = vsyncadd [#allocation11], 4294966272  ;;  %v1492_v0 = vmov 0   ;;  %v1493_v1 = vmov 2   ;;  %v118_v2 = vld [vmem:[%s1645_s0] sm:$0xff]  ;;  %v1280_v4 = vld [vmem:[#allocation2 + $0x78] sm:$0xff]   ;;  %v119_v41 = vlaneseq }
  0x48   :  { %1275 = vset.pattern.permute.xlu0 %v1492_v0  ;;  %1277 = vset.pattern.permute.xlu1 %v1493_v1  ;;  %v135_v3 = vadd.s32 80, %v118_v2  ;;  %v127_v5 = vadd.s32 40, %v118_v2  ;;  %v1281_v6 = vld [vmem:[#allocation2 + $0x38] sm:$0xff]   ;;  %v143_v8 = vadd.s32 120, %v118_v2  ;;  %v1494_v10 = vmov 1   ;;  %v1284_v11 = vld [vmem:[#allocation2 + $0x70] sm:$0xff]  }
  0x49   :  { %123 = vperm.xlu0 %1275, %v118_v2   ;;  %1107 = vmatprep.subr.bf16.mxu0 %v1280_v4  ;;  %v1282_v7 = vld [vmem:[#allocation4 + $0x78] sm:$0xff]   ;;  %v1285_v12 = vld [vmem:[#allocation2 + $0x30] sm:$0xff]   ;;  %v1495_v13 = vmov 3   ;;  %v1288_v16 = vld [vmem:[#allocation2 + $0x68] sm:$0xff]   ;;  %v120_v42 = vand.u32 127, %v119_v41  ;;  %v1497_v2 = vmov 0.0  }
  0x4a   :  { %137 = vperm.xlu1 %1277, %v135_v3   ;;  %1108 = vmatpush3.bf16.msra.mxu0 %v1281_v6  ;;  %v1283_v9 = vld [vmem:[#allocation4 + $0x38] sm:$0xff]   ;;  %v1286_v14 = vld [vmem:[#allocation4 + $0x70] sm:$0xff]   ;;  %v1289_v17 = vld [vmem:[#allocation2 + $0x28] sm:$0xff]   ;;  %v1496_v51 = vmov 1.0|1.0  }
  0x4b   :  { %1129 = vmatprep.subr.bf16.mxu1 %v1282_v7  ;;  %1109 = vmatprep.subr.bf16.mxu0 %v1284_v11  ;;  %v1287_v15 = vld [vmem:[#allocation4 + $0x30] sm:$0xff]   ;;  %v1290_v18 = vld [vmem:[#allocation4 + $0x68] sm:$0xff]   ;;  %v1292_v20 = vld [vmem:[#allocation2 + $0x60] sm:$0xff]   ;;  %v121_v45 = vadd.s32 128, %v120_v42 }
  0x4c   :  { %1130 = vmatpush3.bf16.msra.mxu1 %v1283_v9  ;;  %v1291_v19 = vld [vmem:[#allocation4 + $0x28] sm:$0xff]   ;;  %v1293_v21 = vld [vmem:[#allocation2 + $0x20] sm:$0xff]   ;;  %v1296_v24 = vld [vmem:[#allocation2 + $0x58] sm:$0xff]  }
  0x4d   :  { %1276 = vset.pattern.permute.xlu0 %v1494_v10  ;;  %1131 = vmatprep.subr.bf16.mxu1 %v1286_v14  ;;  %v1294_v22 = vld [vmem:[#allocation4 + $0x60] sm:$0xff]   ;;  %v1297_v25 = vld [vmem:[#allocation2 + $0x18] sm:$0xff]   ;;  %v1300_v28 = vld [vmem:[#allocation2 + $0x50] sm:$0xff]  }
  0x4e   :  { %129 = vperm.xlu0 %1276, %v127_v5   ;;  %1278 = vset.pattern.permute.xlu1 %v1495_v13  ;;  %v1295_v23 = vld [vmem:[#allocation4 + $0x20] sm:$0xff]   ;;  %v1298_v26 = vld [vmem:[#allocation4 + $0x58] sm:$0xff]   ;;  %v1301_v29 = vld [vmem:[#allocation2 + $0x10] sm:$0xff]  }
  0x4f   :  { %145 = vperm.xlu1 %1278, %v143_v8   ;;  %1110 = vmatpush3.bf16.msra.mxu0 %v1285_v12  ;;  %v1299_v27 = vld [vmem:[#allocation4 + $0x18] sm:$0xff]   ;;  %v1302_v30 = vld [vmem:[#allocation4 + $0x50] sm:$0xff]   ;;  %v1304_v32 = vld [vmem:[#allocation2 + $0x48] sm:$0xff]  }
  0x50   :  { %1132 = vmatpush3.bf16.msra.mxu1 %v1287_v15  ;;  %1111 = vmatprep.subr.bf16.mxu0 %v1288_v16  ;;  %v1303_v31 = vld [vmem:[#allocation4 + $0x10] sm:$0xff]   ;;  %v1305_v33 = vld [vmem:[#allocation2 + $0x8] sm:$0xff]   ;;  %v1308_v36 = vld [vmem:[#allocation2 + $0x40] sm:$0xff]  }
  0x51   :  { %1133 = vmatprep.subr.bf16.mxu1 %v1290_v18  ;;  %v1306_v34 = vld [vmem:[#allocation4 + $0x48] sm:$0xff]   ;;  %v1309_v37 = vld [vmem:[#allocation2] sm:$0xff]   ;;  %v1312_v40 = vld [vmem:[#allocation6 + $0x78] sm:$0xff]  }
  0x52   :  { %1279 = vset.pattern.permute.xlu0 %v1495_v13  ;;  %v1307_v35 = vld [vmem:[#allocation4 + $0x8] sm:$0xff]   ;;  %v1310_v38 = vld [vmem:[#allocation4 + $0x40] sm:$0xff]   ;;  %v1313_v49 = vld [vmem:[#allocation6 + $0x38] sm:$0xff]  }
  0x53   :  { %1112 = vmatpush3.bf16.msra.mxu0 %v1289_v17  ;;  %v1311_v39 = vld [vmem:[#allocation4] sm:$0xff]   ;;  %v1314_v50 = vld [vmem:[#allocation6 + $0x70] sm:$0xff]   ;;  %v1316_v53 = vld [vmem:[#allocation6 + $0x68] sm:$0xff]  }
  0x54   :  { %1134 = vmatpush3.bf16.msra.mxu1 %v1291_v19  ;;  %1113 = vmatprep.subr.bf16.mxu0 %v1292_v20  ;;  %v1315_v52 = vld [vmem:[#allocation6 + $0x30] sm:$0xff]   ;;  %v1317_v54 = vld [vmem:[#allocation6 + $0x28] sm:$0xff]   ;;  %v1318_v55 = vld [vmem:[#allocation6 + $0x60] sm:$0xff]  }
  0x55   :  { %1135 = vmatprep.subr.bf16.mxu1 %v1294_v22  ;;  %v1319_v56 = vld [vmem:[#allocation6 + $0x20] sm:$0xff]   ;;  %v1320_v57 = vld [vmem:[#allocation6 + $0x58] sm:$0xff]   ;;  %v1322_v59 = vld [vmem:[#allocation6 + $0x50] sm:$0xff]  }
  0x56   :  { %v1321_v58 = vld [vmem:[#allocation6 + $0x18] sm:$0xff]   ;;  %v1323_v60 = vld [vmem:[#allocation6 + $0x10] sm:$0xff]   ;;  %v1324_v61 = vld [vmem:[#allocation6 + $0x48] sm:$0xff]  }
  0x57   :  { %1114 = vmatpush3.bf16.msra.mxu0 %v1293_v21  ;;  %v1325_v62 = vld [vmem:[#allocation6 + $0x8] sm:$0xff]   ;;  %v1326_v63 = vld [vmem:[#allocation6 + $0x40] sm:$0xff]   ;;  %v1328_v1 = vld [vmem:[#allocation7 + $0x38] sm:$0xff]  }
  0x58   :  { %1136 = vmatpush3.bf16.msra.mxu1 %v1295_v23  ;;  %1115 = vmatprep.subr.bf16.mxu0 %v1296_v24  ;;  %v1327_v0 = vld [vmem:[#allocation6] sm:$0xff]   ;;  %v1329_v3 = vld [vmem:[#allocation7 + $0x30] sm:$0xff]   ;;  %v1330_v4 = vld [vmem:[#allocation7 + $0x28] sm:$0xff]  }
  0x59   :  { %1137 = vmatprep.subr.bf16.mxu1 %v1298_v26  ;;  %v1331_v5 = vld [vmem:[#allocation7 + $0x20] sm:$0xff]   ;;  %v1332_v6 = vld [vmem:[#allocation7 + $0x18] sm:$0xff]   ;;  %v1333_v7 = vld [vmem:[#allocation7 + $0x10] sm:$0xff]  }
  0x5a   :  { %v1334_v8 = vld [vmem:[#allocation7 + $0x8] sm:$0xff]   ;;  %v1335_v9 = vld [vmem:[#allocation7] sm:$0xff]   ;;  %v1336_v10 = vld [vmem:[#allocation9 + $0x38] sm:$0xff]  }
  0x5b   :  { %1116 = vmatpush3.bf16.msra.mxu0 %v1297_v25  ;;  %v1337_v11 = vld [vmem:[#allocation9 + $0x30] sm:$0xff]   ;;  %v1338_v12 = vld [vmem:[#allocation9 + $0x28] sm:$0xff]   ;;  %v1339_v13 = vld [vmem:[#allocation9 + $0x20] sm:$0xff]  }
  0x5c   :  { %1138 = vmatpush3.bf16.msra.mxu1 %v1299_v27  ;;  %1117 = vmatprep.subr.bf16.mxu0 %v1300_v28  ;;  %v1340_v14 = vld [vmem:[#allocation9 + $0x18] sm:$0xff]   ;;  %v1341_v15 = vld [vmem:[#allocation9 + $0x10] sm:$0xff]   ;;  %v1019_v41 = vld [vmem:[%s1650_s5] ss:$0 sm:$0xff] }
  0x5d   :  { %1139 = vmatprep.subr.bf16.mxu1 %v1302_v30 }
  0x5f   :  { %1118 = vmatpush3.bf16.msra.mxu0 %v1301_v29 }
  0x60   :  { %1140 = vmatpush3.bf16.msra.mxu1 %v1303_v31  ;;  %1119 = vmatprep.subr.bf16.mxu0 %v1304_v32 }
  0x61   :  { %1141 = vmatprep.subr.bf16.mxu1 %v1306_v34  ;;  %v1343_v34 = vld [vmem:[#allocation9] sm:$0xff]  }
  0x63   :  { %1120 = vmatpush3.bf16.msra.mxu0 %v1305_v33  ;;  %v1342_v33 = vld [vmem:[#allocation9 + $0x8] sm:$0xff]  }
  0x64   :  { %1142 = vmatpush3.bf16.msra.mxu1 %v1307_v35  ;;  %1121 = vmatprep.subr.bf16.mxu0 %v1308_v36  ;;  %v1344_v35 = vld [vmem:[#allocation10 + $0x38] sm:$0xff]   ;;  %v1345_v36 = vld [vmem:[#allocation10 + $0x30] sm:$0xff]  }
  0x65   :  { %1143 = vmatprep.subr.bf16.mxu1 %v1310_v38  ;;  %v1347_v38 = vld [vmem:[#allocation10 + $0x20] sm:$0xff]  }
  0x67   :  { %1122 = vmatpush3.bf16.msra.mxu0 %v1309_v37  ;;  %v1346_v37 = vld [vmem:[#allocation10 + $0x28] sm:$0xff]  }
  0x68   :  { %1144 = vmatpush3.bf16.msra.mxu1 %v1311_v39  ;;  %1151 = vmatprep.subr.bf16.mxu0 %v1312_v40  ;;  %v1348_v39 = vld [vmem:[#allocation10 + $0x18] sm:$0xff]   ;;  %v1349_v40 = vld [vmem:[#allocation10 + $0x10] sm:$0xff]  }
  0x69   :  { %1200 = vmatprep.subr.bf16.mxu1 %v1497_v2 }
  0xc4   :  { %v124_v43 = vpop.permute.xlu0 %123 }
  0xc5   :  { %v138_v44 = vpop.permute.xlu1 %137  ;;  %vm125_vm0 = vcmp.eq.s32.totalorder %v120_v42, %v124_v43  ;;  %vm126_vm3 = vcmp.eq.s32.totalorder %v121_v45, %v124_v43 }
  0xc6   :  { %vm139_vm5 = vcmp.eq.s32.totalorder %v120_v42, %v138_v44  ;;  %vm140_vm8 = vcmp.eq.s32.totalorder %v121_v45, %v138_v44 }
  0xc9   :  { %v130_v46 = vpop.permute.xlu0 %129 }
  0xca   :  { %vm131_vm1 = vcmp.eq.s32.totalorder %v120_v42, %v130_v46  ;;  %vm132_vm2 = vcmp.eq.s32.totalorder %v121_v45, %v130_v46  ;;  %v146_v47 = vpop.permute.xlu1 %145 }
  0xcb   :  { %vm133_vm4 = vmor %vm125_vm0, %vm131_vm1  ;;  %vm147_vm7 = vcmp.eq.s32.totalorder %v120_v42, %v146_v47  ;;  %vm148_vm10 = vcmp.eq.s32.totalorder %v121_v45, %v146_v47  ;;  %vm1498_vm0 = vmmov 0  }
  0xcc   :  { %vm134_vm6 = vmor %vm126_vm3, %vm132_vm2 }
  0xcd   :  { %vm141_vm9 = vmor %vm133_vm4, %vm139_vm5 }
  0xce   :  { %vm142_vm11 = vmor %vm134_vm6, %vm140_vm8 }
  0xcf   :  { %vm149_vm12 = vmor %vm141_vm9, %vm147_vm7 }
  0xd0   :  { %vm150_vm13 = vmor %vm142_vm11, %vm148_vm10 }
  0xd1   :  { %vm1593_vm14 = vmpackc.low %vm149_vm12, %vm149_vm12 }
  0xd2   :  { %vm1036_vm15 = vmpackc.low %vm150_vm13, %vm150_vm13 }
  0xd3   :  { %1037 = vmatprep.mubr.msk.bf16.mxu0 %vm1036_vm15, %v1496_v51  ;;  %1057 = vmatprep.mubr.msk.bf16.mxu1 %vm1036_vm15, %v1496_v51 }
  0xd4   :  { %1039 = vmatmul.mubr.msk.bf16.vlgmr.msra.gmra.mxu0 %vm1593_vm14, %v1496_v51  ;;  %1059 = vmatmul.mubr.msk.bf16.vlgmr.msra.gmra.mxu1 %vm1593_vm14, %v1496_v51 }
  0xd5   :  { %1152 = vmatpush3.bf16.msra.mxu0 %v1313_v49  ;;  %1077 = vmatprep.mubr.msk.bf16.mxu0 %vm1036_vm15, %v1496_v51 }
  0xd6   :  { %1153 = vmatprep.subr.bf16.mxu0 %v1314_v50  ;;  %1201 = vmatpush3.bf16.msra.mxu1 %v1328_v1  ;;  %v1350_v50 = vld [vmem:[#allocation10 + $0x8] sm:$0xff]  }
  0xd7   :  { %1202 = vmatprep.subr.bf16.mxu1 %v1497_v2  ;;  %1216 = vmatprep.mubr.msk.bf16.mxu1 %vm1498_vm0, %v1497_v2 }
  0xd9   :  { %1154 = vmatpush3.bf16.msra.mxu0 %v1315_v52  ;;  %v1088_v52 = vld [vmem:[%s1652_s7] ss:$0 sm:$0xff] }
  0xda   :  { %1155 = vmatprep.subr.bf16.mxu0 %v1316_v53  ;;  %1203 = vmatpush3.bf16.msra.mxu1 %v1329_v3 }
  0xdb   :  { %1204 = vmatprep.subr.bf16.mxu1 %v1497_v2 }
  0xdd   :  { %1156 = vmatpush3.bf16.msra.mxu0 %v1317_v54 }
  0xde   :  { %1157 = vmatprep.subr.bf16.mxu0 %v1318_v55  ;;  %1205 = vmatpush3.bf16.msra.mxu1 %v1330_v4 }
  0xdf   :  { %1206 = vmatprep.subr.bf16.mxu1 %v1497_v2 }
  0xe1   :  { %1158 = vmatpush3.bf16.msra.mxu0 %v1319_v56 }
  0xe2   :  { %1159 = vmatprep.subr.bf16.mxu0 %v1320_v57  ;;  %1207 = vmatpush3.bf16.msra.mxu1 %v1331_v5 }
  0xe3   :  { %1208 = vmatprep.subr.bf16.mxu1 %v1497_v2 }
  0xe5   :  { %1160 = vmatpush3.bf16.msra.mxu0 %v1321_v58 }
  0xe6   :  { %1161 = vmatprep.subr.bf16.mxu0 %v1322_v59  ;;  %1209 = vmatpush3.bf16.msra.mxu1 %v1332_v6 }
  0xe7   :  { %1210 = vmatprep.subr.bf16.mxu1 %v1497_v2 }
  0xe9   :  { %1162 = vmatpush3.bf16.msra.mxu0 %v1323_v60  ;;  %v1097_v60 = vld [vmem:[%s1654_s9] ss:$0 sm:$0xff] }
  0xea   :  { %1163 = vmatprep.subr.bf16.mxu0 %v1324_v61  ;;  %1211 = vmatpush3.bf16.msra.mxu1 %v1333_v7 }
  0xeb   :  { %1212 = vmatprep.subr.bf16.mxu1 %v1497_v2 }
  0xed   :  { %1164 = vmatpush3.bf16.msra.mxu0 %v1325_v62 }
  0xee   :  { %1165 = vmatprep.subr.bf16.mxu0 %v1326_v63  ;;  %1213 = vmatpush3.bf16.msra.mxu1 %v1334_v8 }
  0xef   :  { %1214 = vmatprep.subr.bf16.mxu1 %v1497_v2 }
  0xf1   :  { %1166 = vmatpush3.bf16.msra.mxu0 %v1327_v0 }
  0xf2   :  { %1220 = vmatprep.subr.bf16.mxu0 %v1497_v2  ;;  %1215 = vmatpush3.bf16.msra.mxu1 %v1335_v9 }
  0xf3   :  { %1240 = vmatprep.subr.bf16.mxu1 %v1497_v2 }
  0xf4   :  { %1079 = vmatmul.mubr.msk.bf16.vlgmr.msra.gmra.mxu0 %vm1593_vm14, %v1496_v51  ;;  %v1351_v51 = vld [vmem:[#allocation10] sm:$0xff]  }
  0xf5   :  { %1236 = vmatprep.mubr.msk.bf16.mxu0 %vm1498_vm0, %v1497_v2  ;;  %1221 = vmatpush3.bf16.msra.mxu0 %v1336_v10 }
  0xf6   :  { %1222 = vmatprep.subr.bf16.mxu0 %v1497_v2 }
  0xf9   :  { %1223 = vmatpush3.bf16.msra.mxu0 %v1337_v11 }
  0xfa   :  { %1224 = vmatprep.subr.bf16.mxu0 %v1497_v2 }
  0xfd   :  { %1225 = vmatpush3.bf16.msra.mxu0 %v1338_v12 }
  0xfe   :  { %1226 = vmatprep.subr.bf16.mxu0 %v1497_v2 }
 0x101   :  { %1227 = vmatpush3.bf16.msra.mxu0 %v1339_v13 }
 0x102   :  { %1228 = vmatprep.subr.bf16.mxu0 %v1497_v2 }
 0x105   :  { %1229 = vmatpush3.bf16.msra.mxu0 %v1340_v14 }
 0x106   :  { %1230 = vmatprep.subr.bf16.mxu0 %v1497_v2 }
 0x109   :  { %1231 = vmatpush3.bf16.msra.mxu0 %v1341_v15 }
 0x10a   :  { %1232 = vmatprep.subr.bf16.mxu0 %v1497_v2 }
 0x10d   :  { %1233 = vmatpush3.bf16.msra.mxu0 %v1342_v33 }
 0x10e   :  { %1234 = vmatprep.subr.bf16.mxu0 %v1497_v2 }
 0x111   :  { %1235 = vmatpush3.bf16.msra.mxu0 %v1343_v34 }
 0x194   :  { %v1123_v16 = vpop.f32.mrf.mxu0  ;;  %v1145_v17 = vpop.f32.mrf.mxu1 }
 0x196   :  { %v1124_v18 = vpop.f32.mrf.mxu0  ;;  %v1146_v19 = vpop.f32.mrf.mxu1 }
 0x197   :  { %v1125_v20 = vadd.f32 %v1124_v18, %v1123_v16  ;;  %v1147_v27 = vadd.f32 %v1146_v19, %v1145_v17 }
 0x198   :  { %v1126_v21 = vpop.f32.mrf.mxu0  ;;  %v1148_v22 = vpop.f32.mrf.mxu1 }
 0x199   :  { %v327_v42 = vadd.f32 %v1125_v20, %v1019_v41 }
 0x19a   :  { %v1127_v23 = vpop.f32.mrf.mxu0  ;;  %v1149_v24 = vpop.f32.mrf.mxu1 }
 0x1b4   :  { %v1167_v25 = vpop.f32.mrf.mxu0 }
 0x1b6   :  { %v1168_v26 = vpop.f32.mrf.mxu0 }
 0x1b7   :  { %v1169_v28 = vadd.f32 %v1168_v26, %v1167_v25 }
 0x1b8   :  { %v1170_v29 = vpop.f32.mrf.mxu0 }
 0x1b9   :  { %v668_v30 = vmul.f32 %v1169_v28, %v1147_v27 }
 0x1ba   :  { %v1171_v31 = vpop.f32.mrf.mxu0 }
 0x1bb   :  { %v669_v32 = vpack.c.bf16 %v668_v30, %v668_v30 }
 0x1bd   :  { %1217 = vmatmul.mubr.bf16.vlgmr.msra.gmra.mxu1 %v669_v32 }
 0x1be   :  { %1256 = vmatprep.mubr.msk.bf16.mxu1 %vm1498_vm0, %v1497_v2  ;;  %1241 = vmatpush3.bf16.msra.mxu1 %v1344_v35 }
 0x1bf   :  { %1242 = vmatprep.subr.bf16.mxu1 %v1497_v2 }
 0x1c2   :  { %1243 = vmatpush3.bf16.msra.mxu1 %v1345_v36 }
 0x1c3   :  { %1244 = vmatprep.subr.bf16.mxu1 %v1497_v2 }
 0x1c6   :  { %1245 = vmatpush3.bf16.msra.mxu1 %v1346_v37 }
 0x1c7   :  { %1246 = vmatprep.subr.bf16.mxu1 %v1497_v2 }
 0x1ca   :  { %1247 = vmatpush3.bf16.msra.mxu1 %v1347_v38 }
 0x1cb   :  { %1248 = vmatprep.subr.bf16.mxu1 %v1497_v2 }
 0x1ce   :  { %1249 = vmatpush3.bf16.msra.mxu1 %v1348_v39 }
 0x1cf   :  { %1250 = vmatprep.subr.bf16.mxu1 %v1497_v2 }
 0x1d2   :  { %1251 = vmatpush3.bf16.msra.mxu1 %v1349_v40 }
 0x1d3   :  { %1252 = vmatprep.subr.bf16.mxu1 %v1497_v2 }
 0x1d6   :  { %1253 = vmatpush3.bf16.msra.mxu1 %v1350_v50 }
 0x1d7   :  { %1254 = vmatprep.subr.bf16.mxu1 %v1497_v2 }
 0x1da   :  { %1255 = vmatpush3.bf16.msra.mxu1 %v1351_v51 }
 0x27d   :  { %v768_v43 = vpop.f32.mrf.mxu1 }
 0x27e   :  { %v774_v44 = vadd.f32 %v768_v43, %v327_v42 }
 0x27f   :  { %v1218_v45 = vpop.f32.mrf.mxu1 }
 0x280   :  { %v775_v46 = vmax.f32 %v774_v44, 0.0 }
 0x281   :  { %v771_v47 = vpop.f32.mrf.mxu1 }
 0x282   :  { %v776_v48 = vpack.c.bf16 %v775_v46, %v775_v46 }
 0x283   :  { %v1219_v49 = vpop.f32.mrf.mxu1 }
 0x284   :  { %1237 = vmatmul.mubr.bf16.vlgmr.msra.gmra.mxu0 %v776_v48 }
 0x344   :  { %v882_v53 = vpop.f32.mrf.mxu0 }
 0x345   :  { %v883_v54 = vadd.f32 %v1088_v52, %v882_v53 }
 0x346   :  { %v1238_v55 = vpop.f32.mrf.mxu0 }
 0x347   :  { %v888_v56 = vmax.f32 %v883_v54, 0.0 }
 0x348   :  { %v885_v57 = vpop.f32.mrf.mxu0 }
 0x349   :  { %v889_v58 = vpack.c.bf16 %v888_v56, %v888_v56 }
 0x34a   :  { %v1239_v59 = vpop.f32.mrf.mxu0 }
 0x34b   :  { %1257 = vmatmul.mubr.bf16.vlgmr.msra.gmra.mxu1 %v889_v58 }
 0x40b   :  { %v995_v61 = vpop.f32.mrf.mxu1 }
 0x40c   :  { %v996_v62 = vadd.f32 %v1097_v60, %v995_v61 }
 0x40d   :  { %v1258_v63 = vpop.f32.mrf.mxu1 }
 0x40e   :  { %v1106_v0 = vmul.f32 -1.442695, %v996_v62 }
 0x40f   :  { %v998_v1 = vpop.f32.mrf.mxu1 }
 0x410   :  { %1352 = vpow2.f32 %v1106_v0 }
 0x411   :  { %v1259_v2 = vpop.f32.mrf.mxu1 }
 0x41d   :  { %v1353_v3 = vpop.eup %1352 }
 0x41e   :  { %v1004_v4 = vadd.f32 1.0, %v1353_v3 }
 0x420   :  { %1354 = vrcp.f32 %v1004_v4 }
 0x42d   :  { %v1355_v5 = vpop.eup %1354 }
 0x42e   :  { %v1007_v6 = vpack.c.bf16 %v1355_v5, %v1355_v5 }
 0x430   :  { %1008 = vst [vmem:[%s1655_s10] sm:$0xf] %v1007_v6 }
 0x431   :  { %1013 = vsyncpa [#allocation3], 1 }
 0x432   :  { %1014 = vsyncpa [#allocation5], 1 }
 0x433   :  { %1015 = vsyncpa [#allocation8], 1 }
 0x434   :  { %1016 = vsyncpa [#allocation11], 1 }

</bundles_post_ra>
